<compile_context>
chip_gen: v7x
topology: tpu7x:2x2x1
jax: 0.10.0
libtpu: 0.0.40
codegen_flags: <defaults>
</compile_context>

<pallas_src>
import functools

import jax
import jax.numpy as jnp
from jax import lax
from jax.experimental import pallas as pl
from jax.experimental.pallas import tpu as pltpu


def _sepconv_fused_kernel(x_ref, w1_ref, p1_ref, gf1_ref, bf1_ref,
                          w2_ref, p2_ref, gf2_ref, bf2_ref,
                          o_ref, ypad_ref, *,
                          K, stride, padding, H1, W1, H2, W2, eps):
    """Fused SepConv forward (both halves).

    x_ref:    (N, H + 2*pad, W*Cin)     input, zero-padded along H only
    w1_ref:   (K, W*Cin, W1*Cmid)       folded dw1 x pw1, one matrix per ky tap
    p1_ref:   (W1*Cmid, W1*Cmid)        0/1 projector summing cols of same channel
    gf1_ref:  (1, W1*Cmid)   bf1_ref: (1, W1*Cmid)   BN1 gamma/beta tiled per column
    w2_ref:   (K, W1*Cmid, W2*Cout)     folded dw2 x pw2
    p2_ref:   (W2*Cout, W2*Cout)
    gf2_ref:  (1, W2*Cout)   bf2_ref: (1, W2*Cout)
    o_ref:    (N*H2, W2*Cout)           lane-dense output
    ypad_ref: (N, H1 + 2*pad, W1*Cmid)  VMEM scratch for the intermediate
    """
    N, _, WC = x_ref.shape

    # ---- block 1: ReLU -> depthwise KxK (stride) -> pointwise 1x1 (folded) --
    x = jnp.maximum(x_ref[...], 0.0)           # ReLU; zero H-pad is invariant
    w1 = w1_ref[...]                           # hoisted out of the tap loop
    cols1 = w1.shape[2]
    M1 = N * H1
    h_strides = None if stride == 1 else (1, stride, 1)
    z1 = None
    for ky in range(K):
        rows = lax.slice(x, (0, ky, 0),
                         (N, ky + (H1 - 1) * stride + 1, WC), h_strides)
        part = jnp.dot(rows.reshape(M1, WC), w1[ky],
                       preferred_element_type=jnp.float32)
        z1 = part if z1 is None else z1 + part

    # ---- BN1: one-pass batch stats (biased var) + fused affine + ReLU -------
    # Reduce rows first (cheap XLU reduce), then project per-column sums onto
    # per-channel sums (and broadcast back across W) with one small 0/1 matmul.
    inv_cnt1 = 1.0 / float(N * H1 * W1)
    sum1 = jnp.dot(jnp.sum(z1, axis=0, keepdims=True), p1_ref[...],
                   preferred_element_type=jnp.float32)
    sq1 = jnp.dot(jnp.sum(z1 * z1, axis=0, keepdims=True), p1_ref[...],
                  preferred_element_type=jnp.float32)
    mean1 = sum1 * inv_cnt1
    var1 = sq1 * inv_cnt1 - mean1 * mean1
    a1 = gf1_ref[...] * lax.rsqrt(var1 + eps)
    c1 = bf1_ref[...] - mean1 * a1
    y = jnp.maximum(z1 * a1 + c1, 0.0)         # BN1 + ReLU (start of block 2)

    # ---- stage intermediate in an H zero-padded VMEM scratch ----------------
    ypad_ref[...] = jnp.zeros(ypad_ref.shape, jnp.float32)
    ypad_ref[:, padding:padding + H1, :] = y.reshape(N, H1, cols1)
    ypad = ypad_ref[...]

    # ---- block 2: depthwise KxK (stride 1) -> pointwise 1x1 (folded) --------
    w2 = w2_ref[...]
    M2 = N * H2
    z2 = None
    for ky in range(K):
        rows = lax.slice(ypad, (0, ky, 0), (N, ky + H2, cols1))
        part = jnp.dot(rows.reshape(M2, cols1), w2[ky],
                       preferred_element_type=jnp.float32)
        z2 = part if z2 is None else z2 + part

    # ---- BN2 + lane-dense store ----------------------------------------------
    inv_cnt2 = 1.0 / float(N * H2 * W2)
    sum2 = jnp.dot(jnp.sum(z2, axis=0, keepdims=True), p2_ref[...],
                   preferred_element_type=jnp.float32)
    sq2 = jnp.dot(jnp.sum(z2 * z2, axis=0, keepdims=True), p2_ref[...],
                  preferred_element_type=jnp.float32)
    mean2 = sum2 * inv_cnt2
    var2 = sq2 * inv_cnt2 - mean2 * mean2
    a2 = gf2_ref[...] * lax.rsqrt(var2 + eps)
    c2 = bf2_ref[...] - mean2 * a2
    o_ref[...] = z2 * a2 + c2                  # lane-dense (N*H2, W2*Cout) store


def _fold_structured_weight(w_dw, w_pw, w_in, w_out, stride, padding):
    """Fold depthwise (K,K,Cin) x pointwise (Cin,Cout) into K matrices of shape
    (w_in*Cin, w_out*Cout); the W-axis conv (with zero padding) is expressed as
    structural zeros so the kernel only has to shift along H (one matmul per ky)."""
    K = w_dw.shape[0]
    eff = (w_dw[:, :, :, None] * w_pw[None, None, :, :]).astype(jnp.float32)
    wp = jnp.arange(w_in)[:, None]               # input column
    wo = jnp.arange(w_out)[None, :]              # output column
    dx = wp - (wo * stride - padding)            # tap index along W
    valid = (dx >= 0) & (dx < K)
    dx_c = jnp.clip(dx, 0, K - 1)
    g = eff[:, dx_c, :, :]                       # (K, w_in, w_out, Cin, Cout)
    g = jnp.where(valid[None, :, :, None, None], g, 0.0)
    g = jnp.transpose(g, (0, 1, 3, 2, 4))        # (K, w_in, Cin, w_out, Cout)
    return g.reshape(K, w_in * w_dw.shape[2], w_out * w_pw.shape[1])


def _channel_projector(w, c):
    """(w*c, w*c) 0/1 matrix summing all columns that share channel (col % c)."""
    idx = jnp.arange(w * c)
    return (idx[:, None] % c == idx[None, :] % c).astype(jnp.float32)


def sepconv_forward(x_nchw, params, *, kernel_size, stride, padding, eps=1e-5):
    """Full SepConv.forward: ReLU->dwconv->pwconv->BN, twice, in one pallas_call."""
    N, Cin, H, W = x_nchw.shape
    K = int(kernel_size)
    Cmid = params["pw1"].shape[1]
    Cout = params["pw2"].shape[1]
    H1 = (H + 2 * padding - K) // stride + 1
    W1 = (W + 2 * padding - K) // stride + 1
    H2 = H1 + 2 * padding - K + 1
    W2 = W1 + 2 * padding - K + 1

    # NCHW -> lane-dense rows (N, H, W*Cin); pad H only (W padding is folded
    # into the structured weights as zeros).
    x_rows = jnp.transpose(x_nchw, (0, 2, 3, 1)).reshape(N, H, W * Cin)
    x_rows = jnp.pad(x_rows.astype(jnp.float32),
                     ((0, 0), (padding, padding), (0, 0)))

    w1 = _fold_structured_weight(params["dw1"], params["pw1"], W, W1, stride, padding)
    w2 = _fold_structured_weight(params["dw2"], params["pw2"], W1, W2, 1, padding)
    p1 = _channel_projector(W1, Cmid)
    p2 = _channel_projector(W2, Cout)
    gf1 = jnp.tile(params["g1"].astype(jnp.float32), W1).reshape(1, W1 * Cmid)
    bf1 = jnp.tile(params["b1"].astype(jnp.float32), W1).reshape(1, W1 * Cmid)
    gf2 = jnp.tile(params["g2"].astype(jnp.float32), W2).reshape(1, W2 * Cout)
    bf2 = jnp.tile(params["b2"].astype(jnp.float32), W2).reshape(1, W2 * Cout)

    kernel = functools.partial(
        _sepconv_fused_kernel, K=K, stride=stride, padding=padding,
        H1=H1, W1=W1, H2=H2, W2=W2, eps=eps)

    out = pl.pallas_call(
        kernel,
        out_shape=jax.ShapeDtypeStruct((N * H2, W2 * Cout), jnp.float32),
        grid=(1,),
        in_specs=[
            pl.BlockSpec(x_rows.shape, lambda i: (0, 0, 0)),
            pl.BlockSpec(w1.shape, lambda i: (0, 0, 0)),
            pl.BlockSpec(p1.shape, lambda i: (0, 0)),
            pl.BlockSpec(gf1.shape, lambda i: (0, 0)),
            pl.BlockSpec(bf1.shape, lambda i: (0, 0)),
            pl.BlockSpec(w2.shape, lambda i: (0, 0, 0)),
            pl.BlockSpec(p2.shape, lambda i: (0, 0)),
            pl.BlockSpec(gf2.shape, lambda i: (0, 0)),
            pl.BlockSpec(bf2.shape, lambda i: (0, 0)),
        ],
        out_specs=pl.BlockSpec((N * H2, W2 * Cout), lambda i: (0, 0)),
        scratch_shapes=[
            pltpu.VMEM((N, H1 + 2 * padding, W1 * Cmid), jnp.float32)],
        compiler_params=pltpu.CompilerParams(
            dimension_semantics=("arbitrary",),
            vmem_limit_bytes=32 * 1024 * 1024),   # explicit, safe on v5e/v6e/v7x
    )(x_rows, w1, p1, gf1, bf1, w2, p2, gf2, bf2)

    # (N*H2, W2*Cout) -> NCHW
    return jnp.transpose(out.reshape(N, H2, W2, Cout), (0, 3, 1, 2))


# ---------------------------------------------------------------------------
# Pure-JAX reference (PyTorch semantics) for correctness checking.
# ---------------------------------------------------------------------------
def _ref_sepconv(x, w_dw1, w_pw1, g1, b1, w_dw2, w_pw2, g2, b2,
                 stride, padding, eps=1e-5):
    dn = ("NCHW", "OIHW", "NCHW")
    C_in = x.shape[1]

    def bn(z, g, b):
        mean = jnp.mean(z, axis=(0, 2, 3), keepdims=True)
        var = jnp.mean((z - mean) ** 2, axis=(0, 2, 3), keepdims=True)
        return ((z - mean) * lax.rsqrt(var + eps)
                * g.reshape(1, -1, 1, 1) + b.reshape(1, -1, 1, 1))

    z = jnp.maximum(x, 0.0)
    z = lax.conv_general_dilated(z, w_dw1, (stride, stride),
                                 [(padding, padding)] * 2, dimension_numbers=dn,
                                 feature_group_count=C_in,
                                 precision=lax.Precision.HIGHEST)
    z = lax.conv_general_dilated(z, w_pw1, (1, 1), [(0, 0), (0, 0)],
                                 dimension_numbers=dn,
                                 precision=lax.Precision.HIGHEST)
    z = bn(z, g1, b1)
    z = jnp.maximum(z, 0.0)
    z = lax.conv_general_dilated(z, w_dw2, (1, 1), [(padding, padding)] * 2,
                                 dimension_numbers=dn,
                                 feature_group_count=C_in,
                                 precision=lax.Precision.HIGHEST)
    z = lax.conv_general_dilated(z, w_pw2, (1, 1), [(0, 0), (0, 0)],
                                 dimension_numbers=dn,
                                 precision=lax.Precision.HIGHEST)
    return bn(z, g2, b2)


if __name__ == "__main__":
    # SepConv(C_in=4, C_out=8, kernel_size=3, stride=1, padding=1, affine=True)
    C_in, C_out, K, stride, padding = 4, 8, 3, 1, 1
    N, H, W = 2, 16, 16

    keys = jax.random.split(jax.random.PRNGKey(0), 10)
    x = jax.random.normal(keys[0], (N, C_in, H, W), jnp.float32)

    # Parameters in PyTorch layout (deterministic synthetic init).
    w_dw1_t = jax.random.normal(keys[1], (C_in, 1, K, K), jnp.float32) * 0.2
    w_pw1_t = jax.random.normal(keys[2], (C_in, C_in, 1, 1), jnp.float32) * 0.2
    g1 = 1.0 + 0.1 * jax.random.normal(keys[3], (C_in,), jnp.float32)
    b1 = 0.1 * jax.random.normal(keys[4], (C_in,), jnp.float32)
    w_dw2_t = jax.random.normal(keys[5], (C_in, 1, K, K), jnp.float32) * 0.2
    w_pw2_t = jax.random.normal(keys[6], (C_out, C_in, 1, 1), jnp.float32) * 0.2
    g2 = 1.0 + 0.1 * jax.random.normal(keys[7], (C_out,), jnp.float32)
    b2 = 0.1 * jax.random.normal(keys[8], (C_out,), jnp.float32)

    # Convert to kernel layouts: depthwise (K,K,Cin), pointwise (Cin,Cout).
    params = {
        "dw1": jnp.transpose(w_dw1_t[:, 0], (1, 2, 0)),
        "pw1": jnp.transpose(w_pw1_t[:, :, 0, 0], (1, 0)),
        "g1": g1, "b1": b1,
        "dw2": jnp.transpose(w_dw2_t[:, 0], (1, 2, 0)),
        "pw2": jnp.transpose(w_pw2_t[:, :, 0, 0], (1, 0)),
        "g2": g2, "b2": b2,
    }

    fwd = jax.jit(functools.partial(
        sepconv_forward, kernel_size=K, stride=stride, padding=padding))
    y = jax.block_until_ready(fwd(x, params))

    y_ref = jax.block_until_ready(
        _ref_sepconv(x, w_dw1_t, w_pw1_t, g1, b1,
                     w_dw2_t, w_pw2_t, g2, b2, stride, padding))

    assert y.shape == (N, C_out, H, W), y.shape
    if not bool(jnp.allclose(y, y_ref, rtol=1e-3, atol=1e-3)):
        max_err = float(jnp.max(jnp.abs(y - y_ref)))
        raise AssertionError(f"Pallas SepConv mismatch, max abs err = {max_err}")

    print("KERNEL_OK")
</pallas_src>

<mosaic_0001>
module attributes {stable_mosaic.version = 11 : i64} {
  func.func @_sepconv_fused_kernel(%arg0: i32, %arg1: memref<2x18x64xf32, #tpu.memory_space<vmem>>, %arg2: memref<3x64x64xf32, #tpu.memory_space<vmem>>, %arg3: memref<64x64xf32, #tpu.memory_space<vmem>>, %arg4: memref<1x64xf32, #tpu.memory_space<vmem>>, %arg5: memref<1x64xf32, #tpu.memory_space<vmem>>, %arg6: memref<3x64x128xf32, #tpu.memory_space<vmem>>, %arg7: memref<128x128xf32, #tpu.memory_space<vmem>>, %arg8: memref<1x128xf32, #tpu.memory_space<vmem>>, %arg9: memref<1x128xf32, #tpu.memory_space<vmem>>, %arg10: memref<32x128xf32, #tpu.memory_space<vmem>>, %arg11: memref<2x18x64xf32, #tpu.memory_space<vmem>>) attributes {dimension_semantics = [#tpu.dimension_semantics<arbitrary>], iteration_bounds = array<i64: 1>, scalar_prefetch = 0 : i64, scratch_operands = 1 : i64, tpu.core_type = #tpu.core_type<tc>, window_params = [{pipeline_mode = #tpu.pipeline_mode<synchronous>, transform_indices = @transform_0, window_bounds = array<i64: 2, 18, 64>}, {pipeline_mode = #tpu.pipeline_mode<synchronous>, transform_indices = @transform_1, window_bounds = array<i64: 3, 64, 64>}, {pipeline_mode = #tpu.pipeline_mode<synchronous>, transform_indices = @transform_2, window_bounds = array<i64: 64, 64>}, {pipeline_mode = #tpu.pipeline_mode<synchronous>, transform_indices = @transform_3, window_bounds = array<i64: 1, 64>}, {pipeline_mode = #tpu.pipeline_mode<synchronous>, transform_indices = @transform_4, window_bounds = array<i64: 1, 64>}, {pipeline_mode = #tpu.pipeline_mode<synchronous>, transform_indices = @transform_5, window_bounds = array<i64: 3, 64, 128>}, {pipeline_mode = #tpu.pipeline_mode<synchronous>, transform_indices = @transform_6, window_bounds = array<i64: 128, 128>}, {pipeline_mode = #tpu.pipeline_mode<synchronous>, transform_indices = @transform_7, window_bounds = array<i64: 1, 128>}, {pipeline_mode = #tpu.pipeline_mode<synchronous>, transform_indices = @transform_8, window_bounds = array<i64: 1, 128>}, {pipeline_mode = #tpu.pipeline_mode<synchronous>, transform_indices = @transform_9, window_bounds = array<i64: 32, 128>}]} {
    %c0 = arith.constant 0 : index
    %c0_0 = arith.constant 0 : index
    %c0_1 = arith.constant 0 : index
    %0 = vector.load %arg1[%c0, %c0_0, %c0_1] : memref<2x18x64xf32, #tpu.memory_space<vmem>>, vector<2x18x64xf32>
    %cst = arith.constant 0.000000e+00 : f32
    %1 = vector.broadcast %cst : f32 to vector<2x18x64xf32>
    %2 = arith.maximumf %0, %1 : vector<2x18x64xf32>
    %c0_2 = arith.constant 0 : index
    %c0_3 = arith.constant 0 : index
    %c0_4 = arith.constant 0 : index
    %3 = vector.load %arg2[%c0_2, %c0_3, %c0_4] : memref<3x64x64xf32, #tpu.memory_space<vmem>>, vector<3x64x64xf32>
    %4 = vector.extract_strided_slice %2 {offsets = [0, 0, 0], sizes = [2, 16, 64], strides = [1, 1, 1]} : vector<2x18x64xf32> to vector<2x16x64xf32>
    %5 = vector.shape_cast %4 : vector<2x16x64xf32> to vector<32x64xf32>
    %6 = vector.extract_strided_slice %3 {offsets = [0, 0, 0], sizes = [1, 64, 64], strides = [1, 1, 1]} : vector<3x64x64xf32> to vector<1x64x64xf32>
    %7 = vector.shape_cast %6 : vector<1x64x64xf32> to vector<64x64xf32>
    %cst_5 = arith.constant dense<0.000000e+00> : vector<32x64xf32>
    %8 = tpu.matmul %5, %7, %cst_5 {dimension_numbers = #tpu.dot_dimension_numbers<[1], [0], [0], [1], [0, 0, 1, 1], [], []>} : vector<32x64xf32>, vector<64x64xf32>, vector<32x64xf32> -> vector<32x64xf32>
    %9 = vector.extract_strided_slice %2 {offsets = [0, 1, 0], sizes = [2, 16, 64], strides = [1, 1, 1]} : vector<2x18x64xf32> to vector<2x16x64xf32>
    %10 = vector.shape_cast %9 : vector<2x16x64xf32> to vector<32x64xf32>
    %11 = vector.extract_strided_slice %3 {offsets = [1, 0, 0], sizes = [1, 64, 64], strides = [1, 1, 1]} : vector<3x64x64xf32> to vector<1x64x64xf32>
    %12 = vector.shape_cast %11 : vector<1x64x64xf32> to vector<64x64xf32>
    %cst_6 = arith.constant dense<0.000000e+00> : vector<32x64xf32>
    %13 = tpu.matmul %10, %12, %cst_6 {dimension_numbers = #tpu.dot_dimension_numbers<[1], [0], [0], [1], [0, 0, 1, 1], [], []>} : vector<32x64xf32>, vector<64x64xf32>, vector<32x64xf32> -> vector<32x64xf32>
    %14 = arith.addf %8, %13 : vector<32x64xf32>
    %15 = vector.extract_strided_slice %2 {offsets = [0, 2, 0], sizes = [2, 16, 64], strides = [1, 1, 1]} : vector<2x18x64xf32> to vector<2x16x64xf32>
    %16 = vector.shape_cast %15 : vector<2x16x64xf32> to vector<32x64xf32>
    %17 = vector.extract_strided_slice %3 {offsets = [2, 0, 0], sizes = [1, 64, 64], strides = [1, 1, 1]} : vector<3x64x64xf32> to vector<1x64x64xf32>
    %18 = vector.shape_cast %17 : vector<1x64x64xf32> to vector<64x64xf32>
    %cst_7 = arith.constant dense<0.000000e+00> : vector<32x64xf32>
    %19 = tpu.matmul %16, %18, %cst_7 {dimension_numbers = #tpu.dot_dimension_numbers<[1], [0], [0], [1], [0, 0, 1, 1], [], []>} : vector<32x64xf32>, vector<64x64xf32>, vector<32x64xf32> -> vector<32x64xf32>
    %20 = arith.addf %14, %19 : vector<32x64xf32>
    %cst_8 = arith.constant dense<0.000000e+00> : vector<64xf32>
    %21 = vector.multi_reduction <add>, %20, %cst_8 [0] : vector<32x64xf32> to vector<64xf32>
    %22 = vector.shape_cast %21 : vector<64xf32> to vector<1x64xf32>
    %c0_9 = arith.constant 0 : index
    %c0_10 = arith.constant 0 : index
    %23 = vector.load %arg3[%c0_9, %c0_10] : memref<64x64xf32, #tpu.memory_space<vmem>>, vector<64x64xf32>
    %cst_11 = arith.constant dense<0.000000e+00> : vector<1x64xf32>
    %24 = tpu.matmul %22, %23, %cst_11 {dimension_numbers = #tpu.dot_dimension_numbers<[1], [0], [0], [1], [0, 0, 1, 1], [], []>} : vector<1x64xf32>, vector<64x64xf32>, vector<1x64xf32> -> vector<1x64xf32>
    %25 = arith.mulf %20, %20 : vector<32x64xf32>
    %cst_12 = arith.constant dense<0.000000e+00> : vector<64xf32>
    %26 = vector.multi_reduction <add>, %25, %cst_12 [0] : vector<32x64xf32> to vector<64xf32>
    %27 = vector.shape_cast %26 : vector<64xf32> to vector<1x64xf32>
    %c0_13 = arith.constant 0 : index
    %c0_14 = arith.constant 0 : index
    %28 = vector.load %arg3[%c0_13, %c0_14] : memref<64x64xf32, #tpu.memory_space<vmem>>, vector<64x64xf32>
    %cst_15 = arith.constant dense<0.000000e+00> : vector<1x64xf32>
    %29 = tpu.matmul %27, %28, %cst_15 {dimension_numbers = #tpu.dot_dimension_numbers<[1], [0], [0], [1], [0, 0, 1, 1], [], []>} : vector<1x64xf32>, vector<64x64xf32>, vector<1x64xf32> -> vector<1x64xf32>
    %cst_16 = arith.constant 0.001953125 : f32
    %30 = vector.broadcast %cst_16 : f32 to vector<1x64xf32>
    %31 = arith.mulf %24, %30 : vector<1x64xf32>
    %cst_17 = arith.constant 0.001953125 : f32
    %32 = vector.broadcast %cst_17 : f32 to vector<1x64xf32>
    %33 = arith.mulf %29, %32 : vector<1x64xf32>
    %34 = arith.mulf %31, %31 : vector<1x64xf32>
    %35 = arith.subf %33, %34 : vector<1x64xf32>
    %c0_18 = arith.constant 0 : index
    %c0_19 = arith.constant 0 : index
    %36 = vector.load %arg4[%c0_18, %c0_19] : memref<1x64xf32, #tpu.memory_space<vmem>>, vector<1x64xf32>
    %cst_20 = arith.constant 9.99999974E-6 : f32
    %37 = vector.broadcast %cst_20 : f32 to vector<1x64xf32>
    %38 = arith.addf %35, %37 : vector<1x64xf32>
    %39 = math.rsqrt %38 : vector<1x64xf32>
    %40 = arith.mulf %36, %39 : vector<1x64xf32>
    %c0_21 = arith.constant 0 : index
    %c0_22 = arith.constant 0 : index
    %41 = vector.load %arg5[%c0_21, %c0_22] : memref<1x64xf32, #tpu.memory_space<vmem>>, vector<1x64xf32>
    %42 = arith.mulf %31, %40 : vector<1x64xf32>
    %43 = arith.subf %41, %42 : vector<1x64xf32>
    %44 = vector.broadcast %40 : vector<1x64xf32> to vector<32x64xf32>
    %45 = arith.mulf %20, %44 : vector<32x64xf32>
    %46 = vector.broadcast %43 : vector<1x64xf32> to vector<32x64xf32>
    %47 = arith.addf %45, %46 : vector<32x64xf32>
    %cst_23 = arith.constant 0.000000e+00 : f32
    %48 = vector.broadcast %cst_23 : f32 to vector<32x64xf32>
    %49 = arith.maximumf %47, %48 : vector<32x64xf32>
    %cst_24 = arith.constant 0.000000e+00 : f32
    %50 = vector.broadcast %cst_24 : f32 to vector<2x18x64xf32>
    %c0_25 = arith.constant 0 : index
    %c0_26 = arith.constant 0 : index
    %c0_27 = arith.constant 0 : index
    %51 = vector.load %arg11[%c0_25, %c0_26, %c0_27] : memref<2x18x64xf32, #tpu.memory_space<vmem>>, vector<2x18x64xf32>
    tpu.vector_store %arg11[%c0_25, %c0_26, %c0_27], %50 {strides = array<i32>} : memref<2x18x64xf32, #tpu.memory_space<vmem>>, vector<2x18x64xf32>,
    %52 = vector.shape_cast %49 : vector<32x64xf32> to vector<2x16x64xf32>
    %c0_28 = arith.constant 0 : index
    %c1 = arith.constant 1 : index
    %c0_29 = arith.constant 0 : index
    %53 = vector.load %arg11[%c0_28, %c1, %c0_29] : memref<2x18x64xf32, #tpu.memory_space<vmem>>, vector<2x16x64xf32>
    tpu.vector_store %arg11[%c0_28, %c1, %c0_29], %52 {strides = array<i32>} : memref<2x18x64xf32, #tpu.memory_space<vmem>>, vector<2x16x64xf32>,
    %c0_30 = arith.constant 0 : index
    %c0_31 = arith.constant 0 : index
    %c0_32 = arith.constant 0 : index
    %54 = vector.load %arg11[%c0_30, %c0_31, %c0_32] : memref<2x18x64xf32, #tpu.memory_space<vmem>>, vector<2x18x64xf32>
    %c0_33 = arith.constant 0 : index
    %c0_34 = arith.constant 0 : index
    %c0_35 = arith.constant 0 : index
    %55 = vector.load %arg6[%c0_33, %c0_34, %c0_35] : memref<3x64x128xf32, #tpu.memory_space<vmem>>, vector<3x64x128xf32>
    %56 = vector.extract_strided_slice %54 {offsets = [0, 0, 0], sizes = [2, 16, 64], strides = [1, 1, 1]} : vector<2x18x64xf32> to vector<2x16x64xf32>
    %57 = vector.shape_cast %56 : vector<2x16x64xf32> to vector<32x64xf32>
    %58 = vector.extract_strided_slice %55 {offsets = [0, 0, 0], sizes = [1, 64, 128], strides = [1, 1, 1]} : vector<3x64x128xf32> to vector<1x64x128xf32>
    %59 = vector.shape_cast %58 : vector<1x64x128xf32> to vector<64x128xf32>
    %cst_36 = arith.constant dense<0.000000e+00> : vector<32x128xf32>
    %60 = tpu.matmul %57, %59, %cst_36 {dimension_numbers = #tpu.dot_dimension_numbers<[1], [0], [0], [1], [0, 0, 1, 1], [], []>} : vector<32x64xf32>, vector<64x128xf32>, vector<32x128xf32> -> vector<32x128xf32>
    %61 = vector.extract_strided_slice %54 {offsets = [0, 1, 0], sizes = [2, 16, 64], strides = [1, 1, 1]} : vector<2x18x64xf32> to vector<2x16x64xf32>
    %62 = vector.shape_cast %61 : vector<2x16x64xf32> to vector<32x64xf32>
    %63 = vector.extract_strided_slice %55 {offsets = [1, 0, 0], sizes = [1, 64, 128], strides = [1, 1, 1]} : vector<3x64x128xf32> to vector<1x64x128xf32>
    %64 = vector.shape_cast %63 : vector<1x64x128xf32> to vector<64x128xf32>
    %cst_37 = arith.constant dense<0.000000e+00> : vector<32x128xf32>
    %65 = tpu.matmul %62, %64, %cst_37 {dimension_numbers = #tpu.dot_dimension_numbers<[1], [0], [0], [1], [0, 0, 1, 1], [], []>} : vector<32x64xf32>, vector<64x128xf32>, vector<32x128xf32> -> vector<32x128xf32>
    %66 = arith.addf %60, %65 : vector<32x128xf32>
    %67 = vector.extract_strided_slice %54 {offsets = [0, 2, 0], sizes = [2, 16, 64], strides = [1, 1, 1]} : vector<2x18x64xf32> to vector<2x16x64xf32>
    %68 = vector.shape_cast %67 : vector<2x16x64xf32> to vector<32x64xf32>
    %69 = vector.extract_strided_slice %55 {offsets = [2, 0, 0], sizes = [1, 64, 128], strides = [1, 1, 1]} : vector<3x64x128xf32> to vector<1x64x128xf32>
    %70 = vector.shape_cast %69 : vector<1x64x128xf32> to vector<64x128xf32>
    %cst_38 = arith.constant dense<0.000000e+00> : vector<32x128xf32>
    %71 = tpu.matmul %68, %70, %cst_38 {dimension_numbers = #tpu.dot_dimension_numbers<[1], [0], [0], [1], [0, 0, 1, 1], [], []>} : vector<32x64xf32>, vector<64x128xf32>, vector<32x128xf32> -> vector<32x128xf32>
    %72 = arith.addf %66, %71 : vector<32x128xf32>
    %cst_39 = arith.constant dense<0.000000e+00> : vector<128xf32>
    %73 = vector.multi_reduction <add>, %72, %cst_39 [0] : vector<32x128xf32> to vector<128xf32>
    %74 = vector.shape_cast %73 : vector<128xf32> to vector<1x128xf32>
    %c0_40 = arith.constant 0 : index
    %c0_41 = arith.constant 0 : index
    %75 = vector.load %arg7[%c0_40, %c0_41] : memref<128x128xf32, #tpu.memory_space<vmem>>, vector<128x128xf32>
    %cst_42 = arith.constant dense<0.000000e+00> : vector<1x128xf32>
    %76 = tpu.matmul %74, %75, %cst_42 {dimension_numbers = #tpu.dot_dimension_numbers<[1], [0], [0], [1], [0, 0, 1, 1], [], []>} : vector<1x128xf32>, vector<128x128xf32>, vector<1x128xf32> -> vector<1x128xf32>
    %77 = arith.mulf %72, %72 : vector<32x128xf32>
    %cst_43 = arith.constant dense<0.000000e+00> : vector<128xf32>
    %78 = vector.multi_reduction <add>, %77, %cst_43 [0] : vector<32x128xf32> to vector<128xf32>
    %79 = vector.shape_cast %78 : vector<128xf32> to vector<1x128xf32>
    %c0_44 = arith.constant 0 : index
    %c0_45 = arith.constant 0 : index
    %80 = vector.load %arg7[%c0_44, %c0_45] : memref<128x128xf32, #tpu.memory_space<vmem>>, vector<128x128xf32>
    %cst_46 = arith.constant dense<0.000000e+00> : vector<1x128xf32>
    %81 = tpu.matmul %79, %80, %cst_46 {dimension_numbers = #tpu.dot_dimension_numbers<[1], [0], [0], [1], [0, 0, 1, 1], [], []>} : vector<1x128xf32>, vector<128x128xf32>, vector<1x128xf32> -> vector<1x128xf32>
    %cst_47 = arith.constant 0.001953125 : f32
    %82 = vector.broadcast %cst_47 : f32 to vector<1x128xf32>
    %83 = arith.mulf %76, %82 : vector<1x128xf32>
    %cst_48 = arith.constant 0.001953125 : f32
    %84 = vector.broadcast %cst_48 : f32 to vector<1x128xf32>
    %85 = arith.mulf %81, %84 : vector<1x128xf32>
    %86 = arith.mulf %83, %83 : vector<1x128xf32>
    %87 = arith.subf %85, %86 : vector<1x128xf32>
    %c0_49 = arith.constant 0 : index
    %c0_50 = arith.constant 0 : index
    %88 = vector.load %arg8[%c0_49, %c0_50] : memref<1x128xf32, #tpu.memory_space<vmem>>, vector<1x128xf32>
    %cst_51 = arith.constant 9.99999974E-6 : f32
    %89 = vector.broadcast %cst_51 : f32 to vector<1x128xf32>
    %90 = arith.addf %87, %89 : vector<1x128xf32>
    %91 = math.rsqrt %90 : vector<1x128xf32>
    %92 = arith.mulf %88, %91 : vector<1x128xf32>
    %c0_52 = arith.constant 0 : index
    %c0_53 = arith.constant 0 : index
    %93 = vector.load %arg9[%c0_52, %c0_53] : memref<1x128xf32, #tpu.memory_space<vmem>>, vector<1x128xf32>
    %94 = arith.mulf %83, %92 : vector<1x128xf32>
    %95 = arith.subf %93, %94 : vector<1x128xf32>
    %96 = vector.broadcast %92 : vector<1x128xf32> to vector<32x128xf32>
    %97 = arith.mulf %72, %96 : vector<32x128xf32>
    %98 = vector.broadcast %95 : vector<1x128xf32> to vector<32x128xf32>
    %99 = arith.addf %97, %98 : vector<32x128xf32>
    %c0_54 = arith.constant 0 : index
    %c0_55 = arith.constant 0 : index
    %100 = vector.load %arg10[%c0_54, %c0_55] : memref<32x128xf32, #tpu.memory_space<vmem>>, vector<32x128xf32>
    tpu.vector_store %arg10[%c0_54, %c0_55], %99 {strides = array<i32>} : memref<32x128xf32, #tpu.memory_space<vmem>>, vector<32x128xf32>,
    return
  }
  func.func @transform_0(%arg0: i32) -> (i32, i32, i32) {
    %c0_i32 = arith.constant 0 : i32
    %c0_i32_0 = arith.constant 0 : i32
    %c0_i32_1 = arith.constant 0 : i32
    %c0_i32_2 = arith.constant 0 : i32
    return %c0_i32, %c0_i32_0, %c0_i32_1 : i32, i32, i32
  }
  func.func @transform_1(%arg0: i32) -> (i32, i32, i32) {
    %c0_i32 = arith.constant 0 : i32
    %c0_i32_0 = arith.constant 0 : i32
    %c0_i32_1 = arith.constant 0 : i32
    %c0_i32_2 = arith.constant 0 : i32
    return %c0_i32, %c0_i32_0, %c0_i32_1 : i32, i32, i32
  }
  func.func @transform_2(%arg0: i32) -> (i32, i32) {
    %c0_i32 = arith.constant 0 : i32
    %c0_i32_0 = arith.constant 0 : i32
    %c0_i32_1 = arith.constant 0 : i32
    return %c0_i32, %c0_i32_0 : i32, i32
  }
  func.func @transform_3(%arg0: i32) -> (i32, i32) {
    %c0_i32 = arith.constant 0 : i32
    %c0_i32_0 = arith.constant 0 : i32
    %c0_i32_1 = arith.constant 0 : i32
    return %c0_i32, %c0_i32_0 : i32, i32
  }
  func.func @transform_4(%arg0: i32) -> (i32, i32) {
    %c0_i32 = arith.constant 0 : i32
    %c0_i32_0 = arith.constant 0 : i32
    %c0_i32_1 = arith.constant 0 : i32
    return %c0_i32, %c0_i32_0 : i32, i32
  }
  func.func @transform_5(%arg0: i32) -> (i32, i32, i32) {
    %c0_i32 = arith.constant 0 : i32
    %c0_i32_0 = arith.constant 0 : i32
    %c0_i32_1 = arith.constant 0 : i32
    %c0_i32_2 = arith.constant 0 : i32
    return %c0_i32, %c0_i32_0, %c0_i32_1 : i32, i32, i32
  }
  func.func @transform_6(%arg0: i32) -> (i32, i32) {
    %c0_i32 = arith.constant 0 : i32
    %c0_i32_0 = arith.constant 0 : i32
    %c0_i32_1 = arith.constant 0 : i32
    return %c0_i32, %c0_i32_0 : i32, i32
  }
  func.func @transform_7(%arg0: i32) -> (i32, i32) {
    %c0_i32 = arith.constant 0 : i32
    %c0_i32_0 = arith.constant 0 : i32
    %c0_i32_1 = arith.constant 0 : i32
    return %c0_i32, %c0_i32_0 : i32, i32
  }
  func.func @transform_8(%arg0: i32) -> (i32, i32) {
    %c0_i32 = arith.constant 0 : i32
    %c0_i32_0 = arith.constant 0 : i32
    %c0_i32_1 = arith.constant 0 : i32
    return %c0_i32, %c0_i32_0 : i32, i32
  }
  func.func @transform_9(%arg0: i32) -> (i32, i32) {
    %c0_i32 = arith.constant 0 : i32
    %c0_i32_0 = arith.constant 0 : i32
    %c0_i32_1 = arith.constant 0 : i32
    return %c0_i32, %c0_i32_0 : i32, i32
  }
}

</mosaic_0001>

<bundles_post_ra>
// kernel: tile.23
= control target key start
LH: loop header
LB: loop body
LE: loop exit
PB: predicated region body
PF: predicated region fallthrough
CT: control target
= control target key end

     0   :  { %s28_s0 = inlined_call_operand.vmem [shape: f32[4], index: 0, kind: input, shape index: {}]   ;;  %s29_s1 = inlined_call_operand.vmem [shape: f32[16,4], index: 1, kind: output, shape index: {}]  }
   0x1   :  { %v4_v0 = vld [vmem:[%s28_s0] ss:$0 sm:$0xff] }
   0x2   :  { %5 = vst [vmem:[%s29_s1] sm:$0xff] %v4_v0  ;;  %8 = vst [vmem:[%s29_s1 + $0x8] sm:$0xff] %v4_v0 }

// kernel: tile.24
= control target key start
LH: loop header
LB: loop body
LE: loop exit
PB: predicated region body
PF: predicated region fallthrough
CT: control target
= control target key end

     0   :  { %s131_s10 = smov 60   ;;  %s132_s11 = smov 52   ;;  %vm3_vm0 = vcmask 31744   ;;  %vm9_vm1 = vcmask 523744   ;;  %vm15_vm2 = vcmask 490944   ;;  %vm21_vm3 = vcmask 458144   ;;  %s207_s0 = inlined_call_operand.vmem [shape: f32[16,4], index: 0, kind: input, shape index: {}]   ;;  %s208_s1 = inlined_call_operand.vmem [shape: f32[1,64], index: 1, kind: output, shape index: {}]  }
   0x1   :  { %v101_v0 = vld [vmem:[%s207_s0 + $0xf] sm:$0x1]   ;;  %v103_v1 = vld [vmem:[%s207_s0 + $0xd] sm:$0x1]   ;;  %v102_v2 = vld [vmem:[%s207_s0 + $0xe] sm:$0x1]  }
   0x2   :  { %7 = vrot.lane.b32.xlu0 %v101_v0, %s131_s10  ;;  %19 = vrot.lane.b32.xlu1 %v103_v1, %s132_s11  ;;  %v104_v3 = vld [vmem:[%s207_s0 + $0xc] sm:$0x1]   ;;  %s133_s16 = smov 56   ;;  %s134_s17 = smov 48   ;;  %v105_v4 = vld [vmem:[%s207_s0 + $0xb] sm:$0x1]  }
   0x3   :  { %v106_v5 = vld [vmem:[%s207_s0 + $0xa] sm:$0x1]   ;;  %v2_v6 = vld [vmem:[%s207_s0] sm:$0x1]   ;;  %s135_s24 = smov 44   ;;  %s136_s25 = smov 40  }
   0x4   :  { %4 = vst.msk [vmem:[#allocation0] sm:$0x1] %vm3_vm0, %v2_v6   ;;  %v107_v7 = vld [vmem:[%s207_s0 + $0x9] sm:$0x1]   ;;  %v108_v8 = vld [vmem:[%s207_s0 + $0x8] sm:$0x1]  }
   0x5   :  { %s137_s30 = smov 36   ;;  %s138_s2 = smov 32   ;;  %v109_v9 = vld [vmem:[%s207_s0 + $0x7] sm:$0x1]   ;;  %v110_v10 = vld [vmem:[%s207_s0 + $0x6] sm:$0x1]  }
   0x6   :  { %13 = vrot.lane.b32.xlu0 %v102_v2, %s133_s16  ;;  %25 = vrot.lane.b32.xlu1 %v104_v3, %s134_s17  ;;  %s139_s7 = smov 28   ;;  %s140_s8 = smov 24   ;;  %v111_v11 = vld [vmem:[%s207_s0 + $0x5] sm:$0x1]   ;;  %v112_v12 = vld [vmem:[%s207_s0 + $0x4] sm:$0x1]  }
   0x7   :  { %s141_s13 = smov 20   ;;  %s142_s14 = smov 16   ;;  %v113_v13 = vld [vmem:[%s207_s0 + $0x3] sm:$0x1]   ;;  %v114_v14 = vld [vmem:[%s207_s0 + $0x2] sm:$0x1]  }
   0x8   :  { %s143_s19 = smov 12   ;;  %s144_s20 = smov 8   ;;  %v115_v15 = vld [vmem:[%s207_s0 + $0x1] sm:$0x1]   ;;  %vm27_vm4 = vcmask 425344   ;;  %vm33_vm5 = vcmask 392544  }
   0x9   :  { %s145_s0 = smov 4   ;;  %vm39_vm6 = vcmask 359744   ;;  %vm45_vm7 = vcmask 326944   ;;  %vm51_vm8 = vcmask 294144   ;;  %vm57_vm9 = vcmask 261344  }
   0xa   :  { %31 = vrot.lane.b32.xlu0 %v105_v4, %s135_s24  ;;  %37 = vrot.lane.b32.xlu1 %v106_v5, %s136_s25  ;;  %vm63_vm10 = vcmask 228544   ;;  %vm69_vm11 = vcmask 195744   ;;  %vm75_vm12 = vcmask 162944   ;;  %vm81_vm13 = vcmask 130144  }
   0xb   :  { %vm87_vm14 = vcmask 97344   ;;  %vm93_vm15 = vcmask 64544  }
   0xe   :  { %43 = vrot.lane.b32.xlu0 %v107_v7, %s137_s30  ;;  %49 = vrot.lane.b32.xlu1 %v108_v8, %s138_s2 }
  0x12   :  { %55 = vrot.lane.b32.xlu0 %v109_v9, %s139_s7  ;;  %61 = vrot.lane.b32.xlu1 %v110_v10, %s140_s8 }
  0x16   :  { %67 = vrot.lane.b32.xlu0 %v111_v11, %s141_s13  ;;  %73 = vrot.lane.b32.xlu1 %v112_v12, %s142_s14 }
  0x1a   :  { %79 = vrot.lane.b32.xlu0 %v113_v13, %s143_s19  ;;  %85 = vrot.lane.b32.xlu1 %v114_v14, %s144_s20 }
  0x1e   :  { %91 = vrot.lane.b32.xlu0 %v115_v15, %s145_s0 }
  0x74   :  { %v8_v16 = vpop.permute.xlu0 %7   ;;  %v20_v17 = vpop.permute.xlu1 %19  }
  0x75   :  { %10 = vst.msk [vmem:[#allocation0] sm:$0x1] %vm9_vm1, %v8_v16  }
  0x78   :  { %v14_v18 = vpop.permute.xlu0 %13   ;;  %v26_v19 = vpop.permute.xlu1 %25  }
  0x79   :  { %16 = vst.msk [vmem:[#allocation0] sm:$0x1] %vm15_vm2, %v14_v18  }
  0x7a   :  { %22 = vst.msk [vmem:[#allocation0] sm:$0x1] %vm21_vm3, %v20_v17  }
  0x7b   :  { %28 = vst.msk [vmem:[#allocation0] sm:$0x1] %vm27_vm4, %v26_v19  }
  0x7c   :  { %v32_v20 = vpop.permute.xlu0 %31   ;;  %v38_v21 = vpop.permute.xlu1 %37  }
  0x7d   :  { %34 = vst.msk [vmem:[#allocation0] sm:$0x1] %vm33_vm5, %v32_v20  }
  0x7e   :  { %40 = vst.msk [vmem:[#allocation0] sm:$0x1] %vm39_vm6, %v38_v21  }
  0x80   :  { %v44_v22 = vpop.permute.xlu0 %43   ;;  %v50_v23 = vpop.permute.xlu1 %49  }
  0x81   :  { %46 = vst.msk [vmem:[#allocation0] sm:$0x1] %vm45_vm7, %v44_v22  }
  0x82   :  { %52 = vst.msk [vmem:[#allocation0] sm:$0x1] %vm51_vm8, %v50_v23  }
  0x84   :  { %v56_v24 = vpop.permute.xlu0 %55   ;;  %v62_v25 = vpop.permute.xlu1 %61  }
  0x85   :  { %58 = vst.msk [vmem:[#allocation0] sm:$0x1] %vm57_vm9, %v56_v24  }
  0x86   :  { %64 = vst.msk [vmem:[#allocation0] sm:$0x1] %vm63_vm10, %v62_v25  }
  0x88   :  { %v68_v26 = vpop.permute.xlu0 %67   ;;  %v74_v27 = vpop.permute.xlu1 %73  }
  0x89   :  { %70 = vst.msk [vmem:[#allocation0] sm:$0x1] %vm69_vm11, %v68_v26  }
  0x8a   :  { %76 = vst.msk [vmem:[#allocation0] sm:$0x1] %vm75_vm12, %v74_v27  }
  0x8c   :  { %v80_v28 = vpop.permute.xlu0 %79   ;;  %v86_v29 = vpop.permute.xlu1 %85  }
  0x8d   :  { %82 = vst.msk [vmem:[#allocation0] sm:$0x1] %vm81_vm13, %v80_v28  }
  0x8e   :  { %88 = vst.msk [vmem:[#allocation0] sm:$0x1] %vm87_vm14, %v86_v29  }
  0x90   :  { %v92_v30 = vpop.permute.xlu0 %91  }
  0x91   :  { %94 = vst.msk [vmem:[#allocation0] sm:$0x1] %vm93_vm15, %v92_v30  }
  0x98   :  { %v98_v31 = vld [vmem:[#allocation0] sm:$0x1] }
  0x99   :  { %100 = vst [vmem:[%s208_s1] sm:$0x1] %v98_v31 }

// kernel: tile.33
= control target key start
LH: loop header
LB: loop body
LE: loop exit
PB: predicated region body
PF: predicated region fallthrough
CT: control target
= control target key end

     0   :  { %s28_s0 = inlined_call_operand.vmem [shape: f32[8], index: 0, kind: input, shape index: {}]   ;;  %s29_s1 = inlined_call_operand.vmem [shape: f32[16,8], index: 1, kind: output, shape index: {}]  }
   0x1   :  { %v4_v0 = vld [vmem:[%s28_s0] ss:$0 sm:$0xff] }
   0x2   :  { %5 = vst [vmem:[%s29_s1] sm:$0xff] %v4_v0  ;;  %8 = vst [vmem:[%s29_s1 + $0x8] sm:$0xff] %v4_v0 }

// kernel: tile.34
= control target key start
LH: loop header
LB: loop body
LE: loop exit
PB: predicated region body
PF: predicated region fallthrough
CT: control target
= control target key end

     0   :  { %s131_s10 = smov 120   ;;  %s132_s11 = smov 104   ;;  %vm3_vm0 = vcmask 64512   ;;  %vm9_vm1 = vcmask 1048512   ;;  %vm15_vm2 = vcmask 982912   ;;  %vm21_vm3 = vcmask 917312   ;;  %s207_s0 = inlined_call_operand.vmem [shape: f32[16,8], index: 0, kind: input, shape index: {}]   ;;  %s208_s1 = inlined_call_operand.vmem [shape: f32[1,128], index: 1, kind: output, shape index: {}]  }
   0x1   :  { %v101_v0 = vld [vmem:[%s207_s0 + $0xf] sm:$0x1]   ;;  %v103_v1 = vld [vmem:[%s207_s0 + $0xd] sm:$0x1]   ;;  %v102_v2 = vld [vmem:[%s207_s0 + $0xe] sm:$0x1]  }
   0x2   :  { %7 = vrot.lane.b32.xlu0 %v101_v0, %s131_s10  ;;  %19 = vrot.lane.b32.xlu1 %v103_v1, %s132_s11  ;;  %v104_v3 = vld [vmem:[%s207_s0 + $0xc] sm:$0x1]   ;;  %s133_s16 = smov 112   ;;  %s134_s17 = smov 96   ;;  %v105_v4 = vld [vmem:[%s207_s0 + $0xb] sm:$0x1]  }
   0x3   :  { %v106_v5 = vld [vmem:[%s207_s0 + $0xa] sm:$0x1]   ;;  %v2_v6 = vld [vmem:[%s207_s0] sm:$0x1]   ;;  %s135_s24 = smov 88   ;;  %s136_s25 = smov 80  }
   0x4   :  { %4 = vst.msk [vmem:[#allocation0] sm:$0x1] %vm3_vm0, %v2_v6   ;;  %v107_v7 = vld [vmem:[%s207_s0 + $0x9] sm:$0x1]   ;;  %v108_v8 = vld [vmem:[%s207_s0 + $0x8] sm:$0x1]  }
   0x5   :  { %s137_s30 = smov 72   ;;  %s138_s2 = smov 64   ;;  %v109_v9 = vld [vmem:[%s207_s0 + $0x7] sm:$0x1]   ;;  %v110_v10 = vld [vmem:[%s207_s0 + $0x6] sm:$0x1]  }
   0x6   :  { %13 = vrot.lane.b32.xlu0 %v102_v2, %s133_s16  ;;  %25 = vrot.lane.b32.xlu1 %v104_v3, %s134_s17  ;;  %s139_s7 = smov 56   ;;  %s140_s8 = smov 48   ;;  %v111_v11 = vld [vmem:[%s207_s0 + $0x5] sm:$0x1]   ;;  %v112_v12 = vld [vmem:[%s207_s0 + $0x4] sm:$0x1]  }
   0x7   :  { %s141_s13 = smov 40   ;;  %s142_s14 = smov 32   ;;  %v113_v13 = vld [vmem:[%s207_s0 + $0x3] sm:$0x1]   ;;  %v114_v14 = vld [vmem:[%s207_s0 + $0x2] sm:$0x1]  }
   0x8   :  { %s143_s19 = smov 24   ;;  %s144_s20 = smov 16   ;;  %v115_v15 = vld [vmem:[%s207_s0 + $0x1] sm:$0x1]   ;;  %vm27_vm4 = vcmask 851712   ;;  %vm33_vm5 = vcmask 786112  }
   0x9   :  { %s145_s0 = smov 8   ;;  %vm39_vm6 = vcmask 720512   ;;  %vm45_vm7 = vcmask 654912   ;;  %vm51_vm8 = vcmask 589312   ;;  %vm57_vm9 = vcmask 523712  }
   0xa   :  { %31 = vrot.lane.b32.xlu0 %v105_v4, %s135_s24  ;;  %37 = vrot.lane.b32.xlu1 %v106_v5, %s136_s25  ;;  %vm63_vm10 = vcmask 458112   ;;  %vm69_vm11 = vcmask 392512   ;;  %vm75_vm12 = vcmask 326912   ;;  %vm81_vm13 = vcmask 261312  }
   0xb   :  { %vm87_vm14 = vcmask 195712   ;;  %vm93_vm15 = vcmask 130112  }
   0xe   :  { %43 = vrot.lane.b32.xlu0 %v107_v7, %s137_s30  ;;  %49 = vrot.lane.b32.xlu1 %v108_v8, %s138_s2 }
  0x12   :  { %55 = vrot.lane.b32.xlu0 %v109_v9, %s139_s7  ;;  %61 = vrot.lane.b32.xlu1 %v110_v10, %s140_s8 }
  0x16   :  { %67 = vrot.lane.b32.xlu0 %v111_v11, %s141_s13  ;;  %73 = vrot.lane.b32.xlu1 %v112_v12, %s142_s14 }
  0x1a   :  { %79 = vrot.lane.b32.xlu0 %v113_v13, %s143_s19  ;;  %85 = vrot.lane.b32.xlu1 %v114_v14, %s144_s20 }
  0x1e   :  { %91 = vrot.lane.b32.xlu0 %v115_v15, %s145_s0 }
  0x74   :  { %v8_v16 = vpop.permute.xlu0 %7   ;;  %v20_v17 = vpop.permute.xlu1 %19  }
  0x75   :  { %10 = vst.msk [vmem:[#allocation0] sm:$0x1] %vm9_vm1, %v8_v16  }
  0x78   :  { %v14_v18 = vpop.permute.xlu0 %13   ;;  %v26_v19 = vpop.permute.xlu1 %25  }
  0x79   :  { %16 = vst.msk [vmem:[#allocation0] sm:$0x1] %vm15_vm2, %v14_v18  }
  0x7a   :  { %22 = vst.msk [vmem:[#allocation0] sm:$0x1] %vm21_vm3, %v20_v17  }
  0x7b   :  { %28 = vst.msk [vmem:[#allocation0] sm:$0x1] %vm27_vm4, %v26_v19  }
  0x7c   :  { %v32_v20 = vpop.permute.xlu0 %31   ;;  %v38_v21 = vpop.permute.xlu1 %37  }
  0x7d   :  { %34 = vst.msk [vmem:[#allocation0] sm:$0x1] %vm33_vm5, %v32_v20  }
  0x7e   :  { %40 = vst.msk [vmem:[#allocation0] sm:$0x1] %vm39_vm6, %v38_v21  }
  0x80   :  { %v44_v22 = vpop.permute.xlu0 %43   ;;  %v50_v23 = vpop.permute.xlu1 %49  }
  0x81   :  { %46 = vst.msk [vmem:[#allocation0] sm:$0x1] %vm45_vm7, %v44_v22  }
  0x82   :  { %52 = vst.msk [vmem:[#allocation0] sm:$0x1] %vm51_vm8, %v50_v23  }
  0x84   :  { %v56_v24 = vpop.permute.xlu0 %55   ;;  %v62_v25 = vpop.permute.xlu1 %61  }
  0x85   :  { %58 = vst.msk [vmem:[#allocation0] sm:$0x1] %vm57_vm9, %v56_v24  }
  0x86   :  { %64 = vst.msk [vmem:[#allocation0] sm:$0x1] %vm63_vm10, %v62_v25  }
  0x88   :  { %v68_v26 = vpop.permute.xlu0 %67   ;;  %v74_v27 = vpop.permute.xlu1 %73  }
  0x89   :  { %70 = vst.msk [vmem:[#allocation0] sm:$0x1] %vm69_vm11, %v68_v26  }
  0x8a   :  { %76 = vst.msk [vmem:[#allocation0] sm:$0x1] %vm75_vm12, %v74_v27  }
  0x8c   :  { %v80_v28 = vpop.permute.xlu0 %79   ;;  %v86_v29 = vpop.permute.xlu1 %85  }
  0x8d   :  { %82 = vst.msk [vmem:[#allocation0] sm:$0x1] %vm81_vm13, %v80_v28  }
  0x8e   :  { %88 = vst.msk [vmem:[#allocation0] sm:$0x1] %vm87_vm14, %v86_v29  }
  0x90   :  { %v92_v30 = vpop.permute.xlu0 %91  }
  0x91   :  { %94 = vst.msk [vmem:[#allocation0] sm:$0x1] %vm93_vm15, %v92_v30  }
  0x98   :  { %v98_v31 = vld [vmem:[#allocation0] sm:$0x1] }
  0x99   :  { %100 = vst [vmem:[%s208_s1] sm:$0x1] %v98_v31 }

// kernel: sepconv_forward.1
= control target key start
LH: loop header
LB: loop body
LE: loop exit
PB: predicated region body
PF: predicated region fallthrough
CT: control target
= control target key end

     0   :  { %vm85_vm0 = vcmask 523264   ;;  %vm74_vm1 = vcmask 1046528   ;;  %vm272_vm2 = vcmask 1045504   ;;  %vm1748_vm3 = vmmov 0   ;;  %s2243_s1 = inlined_call_operand.vmem [shape: f32[3,64,64], index: 1, kind: input, shape index: {}]   ;;  %s2244_s0 = inlined_call_operand.vmem [shape: f32[2,18,64], index: 0, kind: input, shape index: {}]   ;;  %s2245_s2 = inlined_call_operand.vmem [shape: f32[64,64], index: 2, kind: input, shape index: {}]   ;;  %s2246_s5 = inlined_call_operand.vmem [shape: f32[3,64,128], index: 5, kind: input, shape index: {}]   ;;  %s2247_s6 = inlined_call_operand.vmem [shape: f32[128,128], index: 6, kind: input, shape index: {}]   ;;  %s2248_s3 = inlined_call_operand.vmem [shape: f32[1,64], index: 3, kind: input, shape index: {}]   ;;  %s2249_s4 = inlined_call_operand.vmem [shape: f32[1,64], index: 4, kind: input, shape index: {}]   ;;  %s2250_s7 = inlined_call_operand.vmem [shape: f32[1,128], index: 7, kind: input, shape index: {}]   ;;  %s2251_s8 = inlined_call_operand.vmem [shape: f32[1,128], index: 8, kind: input, shape index: {}]   ;;  %s2252_s9 = inlined_call_operand.vmem [shape: f32[32,128], index: 9, kind: output, shape index: {}]  }
   0x1   :  { %v44_v0 = vld [vmem:[%s2243_s1] sm:$0xff]  ;;  %v45_v1 = vld [vmem:[%s2243_s1 + $0x8] sm:$0xff]  ;;  %v46_v2 = vld [vmem:[%s2243_s1 + $0x10] sm:$0xff]  ;;  %vm601_vm4 = vcmask 517120  }
   0x2   :  { %v1572_v3 = vpack.c.bf16 %v45_v1, %v44_v0  ;;  %v47_v4 = vld [vmem:[%s2243_s1 + $0x18] sm:$0xff]  ;;  %v48_v6 = vld [vmem:[%s2243_s1 + $0x20] sm:$0xff]  ;;  %v49_v7 = vld [vmem:[%s2243_s1 + $0x28] sm:$0xff] }
   0x3   :  { %v1576_v5 = vpack.c.bf16 %v47_v4, %v46_v2  ;;  %v52_v8 = vld [vmem:[%s2243_s1 + $0x40] sm:$0xff]  ;;  %v53_v9 = vld [vmem:[%s2243_s1 + $0x48] sm:$0xff]  ;;  %v54_v14 = vld [vmem:[%s2243_s1 + $0x50] sm:$0xff]  ;;  %v1580_v15 = vpack.c.bf16 %v49_v7, %v48_v6  ;;  %v1747_v7 = vmov 0.0|0.0  }
   0x4   :  { %1573 = vmatprep.subr.bf16.mxu0 %v1572_v3  ;;  %v32_v10 = vld [vmem:[%s2244_s0] sm:$0xff]  ;;  %v1556_v11 = vpack.c.bf16 %v53_v9, %v52_v8  ;;  %v33_v13 = vld [vmem:[%s2244_s0 + $0x8] sm:$0xff]  ;;  %v50_v16 = vld [vmem:[%s2243_s1 + $0x30] sm:$0xff] }
   0x5   :  { %1575 = vmatpush3.bf16.msra.mxu0 %v1572_v3  ;;  %v1827_v12 = vmax.f32 %v32_v10, 0.0  ;;  %v1838_v17 = vmax.f32 %v33_v13, 0.0  ;;  %v55_v18 = vld [vmem:[%s2243_s1 + $0x58] sm:$0xff]  ;;  %v56_v21 = vld [vmem:[%s2243_s1 + $0x60] sm:$0xff]  ;;  %v57_v22 = vld [vmem:[%s2243_s1 + $0x68] sm:$0xff] }
   0x6   :  { %1577 = vmatprep.subr.bf16.mxu0 %v1576_v5  ;;  %v51_v19 = vld [vmem:[%s2243_s1 + $0x38] sm:$0xff]  ;;  %1557 = vmatprep.subr.bf16.mxu1 %v1556_v11  ;;  %v1560_v20 = vpack.c.bf16 %v55_v18, %v54_v14  ;;  %v1564_v25 = vpack.c.bf16 %v57_v22, %v56_v21  ;;  %v58_v27 = vld [vmem:[%s2243_s1 + $0x70] sm:$0xff]  ;;  %v60_v31 = vld [vmem:[%s2243_s1 + $0x80] sm:$0xff] }
   0x7   :  { %1354 = vmatprep.mubr.msk.f32.mxu0 %vm85_vm0, %v1827_v12  ;;  %v75_v23 = vrot.slane %v1827_v12, 1  ;;  %1559 = vmatpush3.bf16.msra.mxu1 %v1556_v11  ;;  %v76_v24 = vrot.slane %v1838_v17, 1  ;;  %v1584_v26 = vpack.c.bf16 %v51_v19, %v50_v16  ;;  %v59_v28 = vld [vmem:[%s2243_s1 + $0x78] sm:$0xff]  ;;  %v34_v30 = vld [vmem:[%s2244_s0 + $0x10] sm:$0x3]  ;;  %v61_v32 = vld [vmem:[%s2243_s1 + $0x88] sm:$0xff] }
   0x8   :  { %1561 = vmatprep.subr.bf16.mxu1 %v1560_v20  ;;  %v35_v33 = vld [vmem:[%s2244_s0 + $0x18] sm:$0xff]  ;;  %v36_v34 = vld [vmem:[%s2244_s0 + $0x20] sm:$0xff]  ;;  %v40_v35 = vmax.f32 %v34_v30, 0.0  ;;  %v1568_v36 = vpack.c.bf16 %v59_v28, %v58_v27  ;;  %v37_v37 = vld [vmem:[%s2244_s0 + $0x28] sm:$0x3]  ;;  %v1588_v38 = vpack.c.bf16 %v61_v32, %v60_v31  ;;  %v273_v48 = vrot.slane %v1827_v12, 2 }
   0x9   :  { %1579 = vmatpush3.bf16.msra.mxu0 %v1576_v5  ;;  %v77_v29 = vsel %vm74_vm1, %v75_v23, %v76_v24  ;;  %v62_v39 = vld [vmem:[%s2243_s1 + $0x90] sm:$0xff]  ;;  %v63_v40 = vld [vmem:[%s2243_s1 + $0x98] sm:$0xff]  ;;  %v41_v41 = vmax.f32 %v35_v33, 0.0  ;;  %v42_v42 = vmax.f32 %v36_v34, 0.0  ;;  %v43_v44 = vmax.f32 %v37_v37, 0.0  ;;  %v64_v50 = vld [vmem:[%s2243_s1 + $0xa0] sm:$0xff] }
   0xa   :  { %1581 = vmatprep.subr.bf16.mxu0 %v1580_v15  ;;  %1332 = vmatprep.mubr.msk.f32.mxu1 %vm85_vm0, %v77_v29  ;;  %v78_v43 = vrot.slane %v40_v35, 1  ;;  %v1592_v47 = vpack.c.bf16 %v63_v40, %v62_v39  ;;  %v274_v49 = vrot.slane %v1838_v17, 2  ;;  %v65_v51 = vld [vmem:[%s2243_s1 + $0xa8] sm:$0xff]  ;;  %v66_v57 = vld [vmem:[%s2243_s1 + $0xb0] sm:$0xff]  ;;  %v67_v58 = vld [vmem:[%s2243_s1 + $0xb8] sm:$0xff]  ;;  %v276_v61 = vrot.slane %v40_v35, 2 }
   0xb   :  { %1563 = vmatpush3.bf16.msra.mxu1 %v1560_v20  ;;  %v80_v45 = vrot.slane %v41_v41, 1  ;;  %v81_v46 = vrot.slane %v42_v42, 1  ;;  %v83_v53 = vrot.slane %v43_v44, 1  ;;  %v1596_v55 = vpack.c.bf16 %v65_v51, %v64_v50  ;;  %v393_v4 = vld [vmem:[%s2245_s2] sm:$0xff]  ;;  %v394_v5 = vld [vmem:[%s2245_s2 + $0x8] sm:$0xff]  ;;  %v395_v8 = vld [vmem:[%s2245_s2 + $0x10] sm:$0xff] }
   0xc   :  { %1565 = vmatprep.subr.bf16.mxu1 %v1564_v25  ;;  %v79_v52 = vsel %vm74_vm1, %v76_v24, %v78_v43  ;;  %v275_v56 = vsel %vm272_vm2, %v273_v48, %v274_v49  ;;  %v1600_v60 = vpack.c.bf16 %v67_v58, %v66_v57  ;;  %v278_v62 = vrot.slane %v41_v41, 2  ;;  %v396_v9 = vld [vmem:[%s2245_s2 + $0x18] sm:$0xff]  ;;  %v397_v11 = vld [vmem:[%s2245_s2 + $0x20] sm:$0xff]  ;;  %v398_v12 = vld [vmem:[%s2245_s2 + $0x28] sm:$0xff] }
   0xd   :  { %1583 = vmatpush3.bf16.msra.mxu0 %v1580_v15  ;;  %v82_v54 = vsel %vm74_vm1, %v80_v45, %v81_v46  ;;  %v84_v59 = vsel %vm74_vm1, %v81_v46, %v83_v53  ;;  %v279_v63 = vrot.slane %v42_v42, 2  ;;  %v277_v0 = vsel %vm272_vm2, %v274_v49, %v276_v61  ;;  %v399_v14 = vld [vmem:[%s2245_s2 + $0x30] sm:$0xff]  ;;  %v400_v15 = vld [vmem:[%s2245_s2 + $0x38] sm:$0xff]  ;;  %v625_v61 = vld [vmem:[%s2246_s5 + $0x48] sm:$0xff] }
   0xe   :  { %1585 = vmatprep.subr.bf16.mxu0 %v1584_v26  ;;  %v281_v1 = vrot.slane %v43_v44, 2  ;;  %v1926_v6 = vpack.c.bf16 %v394_v5, %v393_v4  ;;  %v1938_v10 = vpack.c.bf16 %v396_v9, %v395_v8  ;;  %v1611_v13 = vpack.c.bf16 %v398_v12, %v397_v11  ;;  %v630_v4 = vld [vmem:[%s2246_s5 + $0x70] sm:$0xff]  ;;  %v616_v9 = vld [vmem:[%s2246_s5] sm:$0xff] }
   0xf   :  { %1567 = vmatpush3.bf16.msra.mxu1 %v1564_v25  ;;  %v280_v2 = vsel %vm272_vm2, %v278_v62, %v279_v63  ;;  %v1614_v16 = vpack.c.bf16 %v400_v15, %v399_v14  ;;  %v958_v12 = vld [vmem:[%s2247_s6] sm:$0xff]  ;;  %v960_v14 = vld [vmem:[%s2247_s6 + $0x10] sm:$0xff] }
  0x10   :  { %1569 = vmatprep.subr.bf16.mxu1 %v1568_v36  ;;  %v282_v3 = vsel %vm272_vm2, %v279_v63, %v281_v1  ;;  %v626_v63 = vld [vmem:[%s2246_s5 + $0x50] sm:$0xff] }
  0x11   :  { %1587 = vmatpush3.bf16.msra.mxu0 %v1584_v26 }
  0x12   :  { %1589 = vmatprep.subr.bf16.mxu0 %v1588_v38 }
  0x13   :  { %1571 = vmatpush3.bf16.msra.mxu1 %v1568_v36 }
  0x14   :  { %1355 = vmatmul.mubr.msk.f32.vlgmr.msra.gmra.mrb[0].mxu0 %vm85_vm0, %v1838_v17  ;;  %1604 = vmatprep.subr.bf16.mxu1 %v1747_v7  ;;  %v1749_v17 = vmov 0.0  }
  0x15   :  { %1591 = vmatpush3.bf16.msra.mxu0 %v1588_v38  ;;  %1357 = vmatprep.mubr.msk.f32.mxu0 %vm85_vm0, %v41_v41  ;;  %599 = vst.msk [vmem:[#allocation2] sm:$0xff] %vm85_vm0, %v1749_v17  ;;  %600 = vst.msk [vmem:[#allocation2 + $0x8] sm:$0xff] %vm85_vm0, %v1749_v17 }
  0x16   :  { %1593 = vmatprep.subr.bf16.mxu0 %v1592_v47  ;;  %1333 = vmatmul.mubr.msk.f32.vlgmr.msra.gmra.mrb[0].mxu1 %vm85_vm0, %v79_v52  ;;  %603 = vst.msk [vmem:[#allocation2 + $0x18] sm:$0xff] %vm85_vm0, %v1749_v17  ;;  %604 = vst.msk [vmem:[#allocation2 + $0x20] sm:$0xff] %vm85_vm0, %v1749_v17 }
  0x17   :  { %1335 = vmatprep.mubr.msk.f32.mxu1 %vm85_vm0, %v82_v54  ;;  %1606 = vmatpush3.bf16.msra.mxu1 %v1926_v6  ;;  %602 = vst.msk [vmem:[#allocation2 + $0x10] sm:$0x3] %vm601_vm4, %v1749_v17  ;;  %605 = vst.msk [vmem:[#allocation2 + $0x28] sm:$0x3] %vm601_vm4, %v1749_v17 }
  0x18   :  { %1358 = vmatmul.mubr.msk.f32.gmra.mrb[2].mxu0 %vm85_vm0, %v42_v42  ;;  %1607 = vmatprep.subr.bf16.mxu1 %v1747_v7 }
  0x19   :  { %1595 = vmatpush3.bf16.msra.mxu0 %v1592_v47  ;;  %1376 = vmatprep.mubr.msk.f32.mxu0 %vm85_vm0, %v275_v56 }
  0x1a   :  { %1597 = vmatprep.subr.bf16.mxu0 %v1596_v55  ;;  %1336 = vmatmul.mubr.msk.f32.gmra.mrb[2].mxu1 %vm85_vm0, %v84_v59 }
  0x1b   :  { %1609 = vmatpush3.bf16.msra.mxu1 %v1938_v10  ;;  %1398 = vmatprep.mubr.msk.f32.mxu1 %vm1748_vm3, %v1749_v17 }
  0x1c   :  { %1610 = vmatprep.subr.bf16.mxu1 %v1747_v7 }
  0x1d   :  { %1599 = vmatpush3.bf16.msra.mxu0 %v1596_v55 }
  0x1e   :  { %1601 = vmatprep.subr.bf16.mxu0 %v1600_v60 }
  0x1f   :  { %1612 = vmatpush3.bf16.msra.mxu1 %v1611_v13 }
  0x20   :  { %1613 = vmatprep.subr.bf16.mxu1 %v1747_v7 }
  0x21   :  { %1603 = vmatpush3.bf16.msra.mxu0 %v1600_v60  ;;  %v624_v60 = vld [vmem:[%s2246_s5 + $0x40] sm:$0xff] }
  0x22   :  { %1676 = vmatprep.subr.bf16.mxu0 %v1747_v7  ;;  %v1628_v62 = vpack.c.bf16 %v625_v61, %v624_v60 }
  0x23   :  { %1615 = vmatpush3.bf16.msra.mxu1 %v1614_v16 }
  0x24   :  { %1377 = vmatmul.mubr.msk.f32.vlgmr.msra.gmra.mrb[0].mxu0 %vm85_vm0, %v277_v0  ;;  %1616 = vmatprep.subr.bf16.mxu1 %v1747_v7  ;;  %v627_v0 = vld [vmem:[%s2246_s5 + $0x58] sm:$0xff] }
  0x25   :  { %1379 = vmatprep.mubr.msk.f32.mxu0 %vm85_vm0, %v280_v2  ;;  %v1632_v1 = vpack.c.bf16 %v627_v0, %v626_v63  ;;  %v628_v2 = vld [vmem:[%s2246_s5 + $0x60] sm:$0xff] }
  0x28   :  { %1380 = vmatmul.mubr.msk.f32.gmra.mrb[2].mxu0 %vm85_vm0, %v282_v3  ;;  %v629_v3 = vld [vmem:[%s2246_s5 + $0x68] sm:$0xff] }
  0x29   :  { %1518 = vmatprep.mubr.msk.f32.mxu0 %vm1748_vm3, %v1749_v17  ;;  %v1636_v5 = vpack.c.bf16 %v629_v3, %v628_v2 }
  0xe9   :  { %v1334_v18 = vpop.f32.mrb[0].mxu1 }
  0xea   :  { %v160_v19 = vpop.f32.mrb[1].mxu1 }
  0xed   :  { %v1337_v20 = vpop.f32.mrb[2].mxu1 }
  0xee   :  { %v170_v21 = vpop.f32.mrb[3].mxu1 }
  0xf7   :  { %v1378_v22 = vpop.f32.mrb[0].mxu0 }
  0xf8   :  { %v1968_v23 = vadd.f32 %v1378_v22, %v1334_v18  ;;  %v357_v24 = vpop.f32.mrb[1].mxu0 }
  0xf9   :  { %v1970_v25 = vadd.f32 %v357_v24, %v160_v19  ;;  %v962_v19 = vld [vmem:[%s2247_s6 + $0x20] sm:$0xff] }
  0xfa   :  { %v475_v26 = vmul.f32 %v1968_v23, %v1968_v23  ;;  %v381_v27 = vsel %vm85_vm0, %v1968_v23, 0.0 }
  0xfb   :  { %v380_v28 = vsel %vm85_vm0, %v1970_v25, 0.0  ;;  %v474_v29 = vmul.f32 %v1970_v25, %v1970_v25  ;;  %v1381_v30 = vpop.f32.mrb[2].mxu0 }
  0xfc   :  { %v1980_v31 = vadd.f32 %v1381_v30, %v1337_v20  ;;  %v367_v32 = vpop.f32.mrb[3].mxu0  ;;  %v479_v33 = vsel %vm85_vm0, %v475_v26, 0.0  ;;  %v382_v36 = vadd.f32 %v381_v27, %v380_v28  ;;  %v963_v20 = vld [vmem:[%s2247_s6 + $0x28] sm:$0xff] }
  0xfd   :  { %v478_v34 = vsel %vm85_vm0, %v474_v29, 0.0  ;;  %v1984_v35 = vadd.f32 %v367_v32, %v170_v21  ;;  %v2065_v21 = vpack.c.bf16 %v963_v20, %v962_v19  ;;  %v632_v19 = vld [vmem:[%s2246_s5 + $0x80] sm:$0xff]  ;;  %v633_v20 = vld [vmem:[%s2246_s5 + $0x88] sm:$0xff] }
  0xfe   :  { %v480_v39 = vadd.f32 %v479_v33, %v478_v34  ;;  %v385_v41 = vsel %vm85_vm0, %v1980_v31, 0.0  ;;  %v477_v42 = vmul.f32 %v1980_v31, %v1980_v31  ;;  %v576_v34 = vlaneseq }
  0xff   :  { %v383_v37 = vsel %vm85_vm0, %v1984_v35, 0.0  ;;  %v476_v38 = vmul.f32 %v1984_v35, %v1984_v35 }
 0x100   :  { %v384_v40 = vadd.f32 %v383_v37, %v382_v36  ;;  %v483_v47 = vsel %vm85_vm0, %v477_v42, 0.0  ;;  %v577_v36 = vshrl.u32 %v576_v34, 7  ;;  %v568_v37 = vld [vmem:[%s2248_s3] sm:$0x1]  ;;  %v638_v34 = vld [vmem:[%s2246_s5 + $0xb0] sm:$0xff] }
 0x101   :  { %v481_v43 = vsel %vm85_vm0, %v476_v38, 0.0 }
 0x102   :  { %v386_v44 = vadd.f32 %v385_v41, %v384_v40  ;;  %v482_v45 = vadd.f32 %v481_v43, %v480_v39  ;;  %v2073_v38 = vsub.s32 0, %v577_v36  ;;  %v572_v41 = vld [vmem:[%s2249_s4] sm:$0x1]  ;;  %v639_v36 = vld [vmem:[%s2246_s5 + $0xb8] sm:$0xff] }
 0x104   :  { %v387_v46 = vrot.slane %v386_v44, 4  ;;  %v484_v49 = vadd.f32 %v483_v47, %v482_v45 }
 0x106   :  { %v388_v48 = vadd.f32 %v387_v46, %v386_v44  ;;  %v485_v52 = vrot.slane %v484_v49, 4 }
 0x108   :  { %v389_v50 = vrot.slane %v388_v48, 2  ;;  %v486_v55 = vadd.f32 %v485_v52, %v484_v49 }
 0x10a   :  { %v390_v51 = vadd.f32 %v389_v50, %v388_v48  ;;  %v487_v56 = vrot.slane %v486_v55, 2 }
 0x10c   :  { %v391_v53 = vrot.slane %v390_v51, 1  ;;  %v488_v57 = vadd.f32 %v487_v56, %v486_v55 }
 0x10e   :  { %v392_v54 = vadd.f32 %v391_v53, %v390_v51  ;;  %v489_v58 = vrot.slane %v488_v57, 1 }
 0x110   :  { %1399 = vmatmul.mubr.msk.f32.vlgmr.msra.gmra.mrb[4].mxu1 %vm85_vm0, %v392_v54  ;;  %v490_v59 = vadd.f32 %v489_v58, %v488_v57 }
 0x111   :  { %1618 = vmatpush3.bf16.msra.mxu1 %v1926_v6  ;;  %1417 = vmatprep.mubr.msk.f32.mxu1 %vm1748_vm3, %v1749_v17  ;;  %v631_v6 = vld [vmem:[%s2246_s5 + $0x78] sm:$0xff] }
 0x112   :  { %1619 = vmatprep.subr.bf16.mxu1 %v1747_v7  ;;  %v1640_v8 = vpack.c.bf16 %v631_v6, %v630_v4 }
 0x115   :  { %1621 = vmatpush3.bf16.msra.mxu1 %v1938_v10  ;;  %v617_v10 = vld [vmem:[%s2246_s5 + $0x8] sm:$0xff] }
 0x116   :  { %1622 = vmatprep.subr.bf16.mxu1 %v1747_v7  ;;  %v2037_v11 = vpack.c.bf16 %v617_v10, %v616_v9  ;;  %v621_v9 = vld [vmem:[%s2246_s5 + $0x28] sm:$0xff] }
 0x119   :  { %1624 = vmatpush3.bf16.msra.mxu1 %v1611_v13  ;;  %v959_v13 = vld [vmem:[%s2247_s6 + $0x8] sm:$0xff] }
 0x11a   :  { %1625 = vmatprep.subr.bf16.mxu1 %v1747_v7  ;;  %v2049_v15 = vpack.c.bf16 %v959_v13, %v958_v12 }
 0x11c   :  { %1678 = vmatpush3.bf16.msra.mxu0 %v2049_v15 }
 0x11d   :  { %1627 = vmatpush3.bf16.msra.mxu1 %v1614_v16  ;;  %v961_v16 = vld [vmem:[%s2247_s6 + $0x18] sm:$0xff]  ;;  %1679 = vmatprep.subr.bf16.mxu0 %v1747_v7 }
 0x11e   :  { %1629 = vmatprep.subr.bf16.mxu1 %v1628_v62  ;;  %v2055_v18 = vpack.c.bf16 %v961_v16, %v960_v14  ;;  %v622_v14 = vld [vmem:[%s2246_s5 + $0x30] sm:$0xff]  ;;  %v623_v16 = vld [vmem:[%s2246_s5 + $0x38] sm:$0xff] }
 0x120   :  { %1418 = vmatmul.mubr.msk.f32.vlgmr.msra.gmra.mrb[6].mxu1 %vm85_vm0, %v490_v59  ;;  %1681 = vmatpush3.bf16.msra.mxu0 %v2055_v18 }
 0x121   :  { %1631 = vmatpush3.bf16.msra.mxu1 %v1628_v62  ;;  %1682 = vmatprep.subr.bf16.mxu0 %v1747_v7 }
 0x122   :  { %1633 = vmatprep.subr.bf16.mxu1 %v1632_v1 }
 0x124   :  { %1684 = vmatpush3.bf16.msra.mxu0 %v2065_v21 }
 0x125   :  { %1635 = vmatpush3.bf16.msra.mxu1 %v1632_v1  ;;  %1685 = vmatprep.subr.bf16.mxu0 %v1747_v7 }
 0x126   :  { %1637 = vmatprep.subr.bf16.mxu1 %v1636_v5 }
 0x129   :  { %1639 = vmatpush3.bf16.msra.mxu1 %v1636_v5 }
 0x12a   :  { %1641 = vmatprep.subr.bf16.mxu1 %v1640_v8 }
 0x12d   :  { %1643 = vmatpush3.bf16.msra.mxu1 %v1640_v8  ;;  %v620_v8 = vld [vmem:[%s2246_s5 + $0x20] sm:$0xff] }
 0x12e   :  { %1645 = vmatprep.subr.bf16.mxu1 %v2037_v11  ;;  %v1652_v12 = vpack.c.bf16 %v621_v9, %v620_v8 }
 0x1e3   :  { %v470_v22 = vpop.f32.mrb[4].mxu1 }
 0x1e4   :  { %v1400_v24 = vpop.f32.mrb[5].mxu1  ;;  %v564_v26 = vmul.f32 0.001953125, %v470_v22  ;;  %v1660_v22 = vpack.c.bf16 %v633_v20, %v632_v19 }
 0x1e5   :  { %v634_v24 = vld [vmem:[%s2246_s5 + $0x90] sm:$0xff] }
 0x1e6   :  { %v566_v28 = vmul.f32 %v564_v26, %v564_v26 }
 0x1f3   :  { %v560_v27 = vpop.f32.mrb[6].mxu1 }
 0x1f4   :  { %v565_v29 = vmul.f32 0.001953125, %v560_v27  ;;  %v1419_v30 = vpop.f32.mrb[7].mxu1 }
 0x1f6   :  { %v567_v32 = vsub.f32 %v565_v29, %v566_v28  ;;  %v636_v28 = vld [vmem:[%s2246_s5 + $0xa0] sm:$0xff]  ;;  %v637_v29 = vld [vmem:[%s2246_s5 + $0xa8] sm:$0xff] }
 0x1f8   :  { %v569_v33 = vadd.f32 1e-05, %v567_v32 }
 0x1fa   :  { %1743 = vrsqrt.f32 %v569_v33  ;;  %v1668_v33 = vpack.c.bf16 %v637_v29, %v636_v28 }
 0x204   :  { %v1744_v39 = vpop.eup %1743 }
 0x205   :  { %v571_v40 = vmul.f32 %v1744_v39, %v568_v37  ;;  %v1672_v39 = vpack.c.bf16 %v639_v36, %v638_v34  ;;  %v1135_v36 = vld [vmem:[%s2251_s8] sm:$0x1] }
 0x207   :  { %v573_v42 = vmul.f32 %v571_v40, %v564_v26  ;;  %v579_v43 = vrot.slane %v571_v40, %v2073_v38  ;;  %v635_v26 = vld [vmem:[%s2246_s5 + $0x98] sm:$0xff] }
 0x208   :  { %v1664_v27 = vpack.c.bf16 %v635_v26, %v634_v24 }
 0x209   :  { %v574_v44 = vsub.f32 %v572_v41, %v573_v42  ;;  %v581_v45 = vmul.f32 %v1970_v25, %v579_v43  ;;  %v582_v46 = vmul.f32 %v1968_v23, %v579_v43  ;;  %v583_v47 = vmul.f32 %v1984_v35, %v579_v43  ;;  %v618_v23 = vld [vmem:[%s2246_s5 + $0x10] sm:$0xff]  ;;  %v619_v25 = vld [vmem:[%s2246_s5 + $0x18] sm:$0xff] }
 0x20a   :  { %v584_v48 = vmul.f32 %v1980_v31, %v579_v43  ;;  %v1648_v5 = vpack.c.bf16 %v619_v25, %v618_v23  ;;  %v972_v25 = vld [vmem:[%s2247_s6 + $0x70] sm:$0xff] }
 0x20b   :  { %v589_v49 = vrot.slane %v574_v44, %v2073_v38 }
 0x20d   :  { %v591_v50 = vadd.f32 %v589_v49, %v581_v45  ;;  %v592_v51 = vadd.f32 %v589_v49, %v582_v46  ;;  %v593_v52 = vadd.f32 %v589_v49, %v583_v47  ;;  %v594_v53 = vadd.f32 %v589_v49, %v584_v48  ;;  %v964_v47 = vld [vmem:[%s2247_s6 + $0x30] sm:$0xff]  ;;  %v965_v48 = vld [vmem:[%s2247_s6 + $0x38] sm:$0xff] }
 0x20e   :  { %v1686_v49 = vpack.c.bf16 %v965_v48, %v964_v47 }
 0x20f   :  { %v595_v54 = vmax.f32 %v591_v50, 0.0  ;;  %v596_v55 = vmax.f32 %v592_v51, 0.0  ;;  %v597_v56 = vmax.f32 %v593_v52, 0.0  ;;  %v598_v57 = vmax.f32 %v594_v53, 0.0  ;;  %v966_v50 = vld [vmem:[%s2247_s6 + $0x40] sm:$0xff]  ;;  %v967_v51 = vld [vmem:[%s2247_s6 + $0x48] sm:$0xff] }
 0x210   :  { %1687 = vmatpush3.bf16.msra.mxu0 %v1686_v49  ;;  %v1689_v52 = vpack.c.bf16 %v967_v51, %v966_v50  ;;  %v968_v53 = vld [vmem:[%s2247_s6 + $0x50] sm:$0xff] }
 0x211   :  { %606 = vst.msk [vmem:[#allocation2 + $0x1] sm:$0xff] %vm85_vm0, %v595_v54  ;;  %607 = vst.msk [vmem:[#allocation2 + $0x9] sm:$0xff] %vm85_vm0, %v596_v55  ;;  %1688 = vmatprep.subr.bf16.mxu0 %v1747_v7  ;;  %v969_v54 = vld [vmem:[%s2247_s6 + $0x58] sm:$0xff] }
 0x212   :  { %608 = vst.msk [vmem:[#allocation2 + $0x19] sm:$0xff] %vm85_vm0, %v597_v56  ;;  %609 = vst.msk [vmem:[#allocation2 + $0x21] sm:$0xff] %vm85_vm0, %v598_v57  ;;  %v1692_v55 = vpack.c.bf16 %v969_v54, %v968_v53  ;;  %v970_v56 = vld [vmem:[%s2247_s6 + $0x60] sm:$0xff]  ;;  %v971_v57 = vld [vmem:[%s2247_s6 + $0x68] sm:$0xff] }
 0x213   :  { %v1695_v23 = vpack.c.bf16 %v971_v57, %v970_v56 }
 0x214   :  { %1690 = vmatpush3.bf16.msra.mxu0 %v1689_v52 }
 0x215   :  { %1691 = vmatprep.subr.bf16.mxu0 %v1747_v7 }
 0x218   :  { %v610_v31 = vld [vmem:[#allocation2] sm:$0xff]  ;;  %v2094_v35 = vld [vmem:[#allocation2 + $0x8] sm:$0xff]  ;;  %v2096_v58 = vld [vmem:[#allocation2 + $0x10] sm:$0x3]  ;;  %1693 = vmatpush3.bf16.msra.mxu0 %v1692_v55 }
 0x219   :  { %v646_v59 = vrot.slane %v610_v31, 1  ;;  %v647_v60 = vrot.slane %v2094_v35, 1  ;;  %v649_v61 = vrot.slane %v2096_v58, 1  ;;  %v2100_v62 = vld [vmem:[#allocation2 + $0x18] sm:$0xff]  ;;  %v2102_v63 = vld [vmem:[#allocation2 + $0x20] sm:$0xff]  ;;  %v842_v30 = vrot.slane %v610_v31, 2  ;;  %1694 = vmatprep.subr.bf16.mxu0 %v1747_v7 }
 0x21a   :  { %v651_v0 = vrot.slane %v2100_v62, 1  ;;  %v652_v1 = vrot.slane %v2102_v63, 1  ;;  %v615_v2 = vld [vmem:[#allocation2 + $0x28] sm:$0x3]  ;;  %v843_v32 = vrot.slane %v2094_v35, 2  ;;  %v845_v40 = vrot.slane %v2096_v58, 2 }
 0x21b   :  { %v648_v3 = vsel %vm74_vm1, %v646_v59, %v647_v60  ;;  %v650_v4 = vsel %vm74_vm1, %v647_v60, %v649_v61  ;;  %v654_v6 = vrot.slane %v615_v2, 1  ;;  %v847_v41 = vrot.slane %v2100_v62, 2 }
 0x21c   :  { %1436 = vmatprep.mubr.msk.f32.mxu1 %vm85_vm0, %v648_v3  ;;  %v653_v10 = vsel %vm74_vm1, %v651_v0, %v652_v1  ;;  %v844_v37 = vsel %vm272_vm2, %v842_v30, %v843_v32  ;;  %v848_v42 = vrot.slane %v2102_v63, 2  ;;  %v846_v43 = vsel %vm272_vm2, %v843_v32, %v845_v40  ;;  %1696 = vmatpush3.bf16.msra.mxu0 %v1695_v23 }
 0x21d   :  { %1437 = vmatmul.mubr.msk.f32.vlgmr.msra.gmra.mrb[8].mxu1 %vm85_vm0, %v650_v4  ;;  %v655_v13 = vsel %vm74_vm1, %v652_v1, %v654_v6  ;;  %v850_v44 = vrot.slane %v615_v2, 2  ;;  %1697 = vmatprep.subr.bf16.mxu0 %v1747_v7 }
 0x21e   :  { %1647 = vmatpush3.bf16.msra.mxu1 %v2037_v11  ;;  %1439 = vmatprep.mubr.msk.f32.mxu1 %vm85_vm0, %v653_v10  ;;  %v1656_v11 = vpack.c.bf16 %v623_v16, %v622_v14  ;;  %v849_v45 = vsel %vm272_vm2, %v847_v41, %v848_v42 }
 0x21f   :  { %1649 = vmatprep.subr.bf16.mxu1 %v1648_v5  ;;  %v851_v46 = vsel %vm272_vm2, %v848_v42, %v850_v44 }
 0x221   :  { %1440 = vmatmul.mubr.msk.f32.gmra.mrb[10].mxu1 %vm85_vm0, %v655_v13 }
 0x222   :  { %1651 = vmatpush3.bf16.msra.mxu1 %v1648_v5  ;;  %1458 = vmatprep.mubr.msk.f32.mxu1 %vm85_vm0, %v610_v31  ;;  %v973_v31 = vld [vmem:[%s2247_s6 + $0x78] sm:$0xff] }
 0x223   :  { %1653 = vmatprep.subr.bf16.mxu1 %v1652_v12 }
 0x226   :  { %1655 = vmatpush3.bf16.msra.mxu1 %v1652_v12 }
 0x227   :  { %1657 = vmatprep.subr.bf16.mxu1 %v1656_v11 }
 0x22a   :  { %1659 = vmatpush3.bf16.msra.mxu1 %v1656_v11 }
 0x22b   :  { %1661 = vmatprep.subr.bf16.mxu1 %v1660_v22 }
 0x22d   :  { %1459 = vmatmul.mubr.msk.f32.vlgmr.msra.gmra.mrb[8].mxu1 %vm85_vm0, %v2094_v35  ;;  %v1698_v35 = vpack.c.bf16 %v973_v31, %v972_v25 }
 0x22e   :  { %1461 = vmatprep.mubr.msk.f32.mxu1 %vm85_vm0, %v2100_v62  ;;  %1663 = vmatpush3.bf16.msra.mxu1 %v1660_v22 }
 0x22f   :  { %1665 = vmatprep.subr.bf16.mxu1 %v1664_v27  ;;  %1699 = vmatpush3.bf16.msra.mxu0 %v1698_v35 }
 0x230   :  { %1700 = vmatprep.subr.bf16.mxu0 %v1747_v7 }
 0x231   :  { %1462 = vmatmul.mubr.msk.f32.gmra.mrb[10].mxu1 %vm85_vm0, %v2102_v63 }
 0x232   :  { %1667 = vmatpush3.bf16.msra.mxu1 %v1664_v27  ;;  %1480 = vmatprep.mubr.msk.f32.mxu1 %vm85_vm0, %v844_v37 }
 0x233   :  { %1669 = vmatprep.subr.bf16.mxu1 %v1668_v33 }
 0x236   :  { %1671 = vmatpush3.bf16.msra.mxu1 %v1668_v33  ;;  %v1131_v33 = vld [vmem:[%s2250_s7] sm:$0x1] }
 0x237   :  { %1673 = vmatprep.subr.bf16.mxu1 %v1672_v39 }
 0x23a   :  { %1675 = vmatpush3.bf16.msra.mxu1 %v1672_v39 }
 0x23d   :  { %1481 = vmatmul.mubr.msk.f32.vlgmr.msra.gmra.mrb[8].mxu1 %vm85_vm0, %v846_v43 }
 0x23e   :  { %1483 = vmatprep.mubr.msk.f32.mxu1 %vm85_vm0, %v849_v45 }
 0x241   :  { %1484 = vmatmul.mubr.msk.f32.gmra.mrb[10].mxu1 %vm85_vm0, %v851_v46 }
 0x310   :  { %v2205_v58 = vpop.f32.mrb[8].mxu1 }
 0x311   :  { %v1045_v59 = vmul.f32 %v2205_v58, %v2205_v58  ;;  %v926_v60 = vpop.f32.mrb[9].mxu1 }
 0x312   :  { %v949_v61 = vadd.f32 %v2205_v58, %v926_v60  ;;  %v1044_v62 = vmul.f32 %v926_v60, %v926_v60 }
 0x314   :  { %v1048_v63 = vadd.f32 %v1045_v59, %v1044_v62  ;;  %v1485_v0 = vpop.f32.mrb[10].mxu1 }
 0x315   :  { %v936_v1 = vpop.f32.mrb[11].mxu1  ;;  %v1047_v4 = vmul.f32 %v1485_v0, %v1485_v0 }
 0x316   :  { %v950_v2 = vadd.f32 %v949_v61, %v936_v1  ;;  %v1046_v3 = vmul.f32 %v936_v1, %v936_v1 }
 0x318   :  { %v951_v5 = vadd.f32 %v1485_v0, %v950_v2  ;;  %v1049_v6 = vadd.f32 %v1048_v63, %v1046_v3 }
 0x31a   :  { %v952_v8 = vrot.slane %v951_v5, 4  ;;  %v1050_v9 = vadd.f32 %v1049_v6, %v1047_v4 }
 0x31c   :  { %v953_v10 = vadd.f32 %v952_v8, %v951_v5  ;;  %v1051_v11 = vrot.slane %v1050_v9, 4 }
 0x31e   :  { %v954_v12 = vrot.slane %v953_v10, 2  ;;  %v1052_v19 = vadd.f32 %v1051_v11, %v1050_v9 }
 0x320   :  { %v955_v13 = vadd.f32 %v954_v12, %v953_v10 }
 0x322   :  { %v956_v14 = vrot.slane %v955_v13, 1 }
 0x324   :  { %v957_v16 = vadd.f32 %v956_v14, %v955_v13 }
 0x326   :  { %1519 = vmatmul.mubr.f32.vlgmr.msra.gmra.mrb[4].mxu0 %v957_v16 }
 0x327   :  { %1702 = vmatpush3.bf16.msra.mxu0 %v2049_v15  ;;  %1553 = vmatprep.mubr.msk.f32.mxu0 %vm1748_vm3, %v1749_v17  ;;  %v1053_v15 = vrot.slane %v1052_v19, 2 }
 0x328   :  { %1703 = vmatprep.subr.bf16.mxu0 %v1747_v7 }
 0x329   :  { %v1054_v17 = vadd.f32 %v1053_v15, %v1052_v19 }
 0x32b   :  { %1705 = vmatpush3.bf16.msra.mxu0 %v2055_v18  ;;  %v1055_v18 = vrot.slane %v1054_v17, 1 }
 0x32c   :  { %1706 = vmatprep.subr.bf16.mxu0 %v1747_v7 }
 0x32f   :  { %1708 = vmatpush3.bf16.msra.mxu0 %v2065_v21  ;;  %v1056_v21 = vadd.f32 %v1055_v18, %v1054_v17 }
 0x330   :  { %1709 = vmatprep.subr.bf16.mxu0 %v1747_v7 }
 0x333   :  { %1711 = vmatpush3.bf16.msra.mxu0 %v1686_v49 }
 0x334   :  { %1712 = vmatprep.subr.bf16.mxu0 %v1747_v7 }
 0x337   :  { %1714 = vmatpush3.bf16.msra.mxu0 %v1689_v52 }
 0x338   :  { %1715 = vmatprep.subr.bf16.mxu0 %v1747_v7 }
 0x33b   :  { %1717 = vmatpush3.bf16.msra.mxu0 %v1692_v55 }
 0x33c   :  { %1718 = vmatprep.subr.bf16.mxu0 %v1747_v7 }
 0x33f   :  { %1720 = vmatpush3.bf16.msra.mxu0 %v1695_v23 }
 0x340   :  { %1721 = vmatprep.subr.bf16.mxu0 %v1747_v7 }
 0x343   :  { %1723 = vmatpush3.bf16.msra.mxu0 %v1698_v35 }
 0x346   :  { %1554 = vmatmul.mubr.f32.vlgmr.msra.gmra.mrb[6].mxu0 %v1056_v21 }
 0x3f9   :  { %v1040_v20 = vpop.f32.mrb[4].mxu0 }
 0x3fa   :  { %v1520_v22 = vpop.f32.mrb[5].mxu0  ;;  %v1127_v24 = vmul.f32 0.001953125, %v1040_v20 }
 0x3fc   :  { %v1129_v27 = vmul.f32 %v1127_v24, %v1127_v24 }
 0x419   :  { %v1123_v26 = vpop.f32.mrb[6].mxu0 }
 0x41a   :  { %v1128_v28 = vmul.f32 0.001953125, %v1123_v26  ;;  %v1555_v29 = vpop.f32.mrb[7].mxu0 }
 0x41c   :  { %v1130_v30 = vsub.f32 %v1128_v28, %v1129_v27 }
 0x41e   :  { %v1132_v32 = vadd.f32 1e-05, %v1130_v30 }
 0x420   :  { %1745 = vrsqrt.f32 %v1132_v32 }
 0x42a   :  { %v1746_v34 = vpop.eup %1745 }
 0x42b   :  { %v1134_v7 = vmul.f32 %v1746_v34, %v1131_v33 }
 0x42d   :  { %v1136_v37 = vmul.f32 %v1134_v7, %v1127_v24  ;;  %v1142_v39 = vrot.slane %v1134_v7, %v2073_v38 }
 0x42f   :  { %v1137_v40 = vsub.f32 %v1135_v36, %v1136_v37  ;;  %v1144_v41 = vmul.f32 %v1142_v39, %v926_v60  ;;  %v1145_v42 = vmul.f32 %v2205_v58, %v1142_v39  ;;  %v1146_v43 = vmul.f32 %v1142_v39, %v936_v1 }
 0x430   :  { %v1147_v44 = vmul.f32 %v1485_v0, %v1142_v39 }
 0x431   :  { %v1152_v45 = vrot.slane %v1137_v40, %v2073_v38 }
 0x433   :  { %v1154_v46 = vadd.f32 %v1152_v45, %v1144_v41  ;;  %v1155_v47 = vadd.f32 %v1152_v45, %v1145_v42  ;;  %v1156_v48 = vadd.f32 %v1152_v45, %v1146_v43  ;;  %v1157_v49 = vadd.f32 %v1152_v45, %v1147_v44 }
 0x435   :  { %1158 = vst [vmem:[%s2252_s9] sm:$0xff] %v1154_v46  ;;  %1159 = vst [vmem:[%s2252_s9 + $0x8] sm:$0xff] %v1155_v47 }
 0x436   :  { %1160 = vst [vmem:[%s2252_s9 + $0x10] sm:$0xff] %v1156_v48  ;;  %1161 = vst [vmem:[%s2252_s9 + $0x18] sm:$0xff] %v1157_v49 }

</bundles_post_ra>
